<compile_context>
chip_gen: v7x
topology: tpu7x:2x2x1
jax: 0.10.0
libtpu: 0.0.40
codegen_flags: <defaults>
</compile_context>

<pallas_src>
import functools
import math

import jax
import jax.numpy as jnp
from jax.experimental import pallas as pl
from jax.experimental.pallas import tpu as pltpu

EPS = 1e-5  # torch.nn.LayerNorm default


def _round_up(n, m):
    return ((n + m - 1) // m) * m


def _cdiv(a, b):
    return -(-a // b)


def _vmem_budget_bytes():
    """~3/4 of physical VMEM; conservative fallback if the query fails."""
    try:
        phys = int(pltpu.get_tpu_info().vmem_capacity_bytes)
    except Exception:
        phys = 64 << 20  # assume the smallest (v7x per-core) VMEM
    return (phys * 3) // 4


def _choose_tiles(rows, d_pad, dout128, x_itemsize, w_itemsize, out_itemsize,
                  req_tm, req_tn, pack, vmem_budget):
    """Pick (tile_rows, rows_pad, tile_n, n_out_tiles, dout_pad), all Python ints."""
    # --- row tile: f32 temporaries (x, centered, x_hat) + up to 3 x buffers ---
    per_row_bytes = d_pad * (3 * 4 + 3 * x_itemsize)
    tm_cap = max(pack, int(0.35 * vmem_budget) // max(per_row_bytes, 1))
    tm = min(req_tm, tm_cap, _round_up(rows, pack))
    tm = max(pack, (tm // pack) * pack)
    rows_pad = _round_up(rows, tm)

    # --- output-feature tile: whole folded weight resident if it fits ---
    fixed = tm * per_row_bytes
    per_col_bytes = 2 * d_pad * w_itemsize + tm * (2 * out_itemsize + 4)
    avail = max(0, int(0.9 * vmem_budget) - fixed)
    tn_cap = max(128, (avail // max(per_col_bytes, 1)) // 128 * 128)
    req = dout128 if req_tn is None else max(128, _round_up(req_tn, 128))
    tn = min(dout128, tn_cap, req)
    n_out = _cdiv(dout128, tn)
    tn = _round_up(_cdiv(dout128, n_out), 128)  # balance the tiles
    dout_pad = n_out * tn
    return tm, rows_pad, tn, n_out, dout_pad


def _prenorm_kernel(x_ref, mask_ref, w_ref, wb_ref, o_ref, *,
                    d_real, masked, compute_dtype):
    # x_ref:   (TM, Dp)  rows tile (lane-padded features, pad lanes zero)
    # mask_ref:(1,  Dp)  f32 lane mask (1 for real lanes), read only if `masked`
    # w_ref:   (Dp, TN)  folded weight tile (gamma folded in; pad rows zero)
    # wb_ref:  (1,  TN)  folded bias tile (beta@w + wb, f32; pad lanes zero)
    # o_ref:   (TM, TN)
    x = x_ref[...].astype(jnp.float32)
    inv_d = jnp.float32(1.0 / d_real)

    # LayerNorm statistics over the *real* D (biased variance, torch-style).
    # Padded lanes of x are zero, so the plain sum already equals the real sum.
    mean = jnp.sum(x, axis=-1, keepdims=True) * inv_d
    centered = x - mean
    if masked:
        centered = centered * mask_ref[...]       # zero padded lanes: one vmul
    var = jnp.sum(centered * centered, axis=-1, keepdims=True) * inv_d
    x_hat = centered * jax.lax.rsqrt(var + EPS)

    # fused fn: Linear on the MXU (f32 accumulation)
    out = jnp.dot(x_hat.astype(compute_dtype), w_ref[...],
                  preferred_element_type=jnp.float32)
    out = out + wb_ref[...]
    o_ref[...] = out.astype(o_ref.dtype)


def fold_prenorm_params(gamma, beta, w, wb, compute_dtype=jnp.float32):
    """Fold the LayerNorm affine into the Linear layer (do once & cache for inference)."""
    w_f32 = w.astype(jnp.float32)
    w_fold = (gamma.astype(jnp.float32)[:, None] * w_f32).astype(compute_dtype)
    wb_fold = beta.astype(jnp.float32) @ w_f32 + wb.astype(jnp.float32)
    return w_fold, wb_fold


def _prenorm_linear_folded(x, w_fold, wb_fold, *, tile_rows, tile_n, compute_dtype):
    orig_shape = x.shape
    D = orig_shape[-1]
    Dout = w_fold.shape[1]
    rows = math.prod(orig_shape[:-1]) if len(orig_shape) > 1 else 1

    x_itemsize = jnp.dtype(x.dtype).itemsize
    w_itemsize = jnp.dtype(compute_dtype).itemsize
    out_itemsize = x_itemsize
    pack = max(8, 32 // x_itemsize)          # sublane packing (f32:8, bf16:16)

    D_pad = _round_up(D, 128)                # lane-dense input features
    Dout128 = _round_up(Dout, 128)

    vmem_budget = _vmem_budget_bytes()
    tm, rows_pad, tn, n_out, Dout_pad = _choose_tiles(
        rows, D_pad, Dout128, x_itemsize, w_itemsize, out_itemsize,
        tile_rows, tile_n, pack, vmem_budget)
    n_row_tiles = rows_pad // tm

    # ---- operands (pads only when actually required; zeros keep math exact) ----
    x2 = x.reshape(rows, D)
    if rows_pad != rows or D_pad != D:
        x2 = jnp.pad(x2, ((0, rows_pad - rows), (0, D_pad - D)))

    wf = w_fold.astype(compute_dtype)
    if D_pad != D or Dout_pad != Dout:
        wf = jnp.pad(wf, ((0, D_pad - D), (0, Dout_pad - Dout)))
    # tile-contiguous weight layout: tile j = columns [j*tn, (j+1)*tn)
    w_tiled = wf.reshape(D_pad, n_out, tn).swapaxes(0, 1)      # (n_out, D_pad, tn)

    wb_p = wb_fold.astype(jnp.float32)
    if Dout_pad != Dout:
        wb_p = jnp.pad(wb_p, ((0, Dout_pad - Dout),))
    wb_p = wb_p.reshape(1, Dout_pad)

    masked = (D_pad != D)
    lane_mask = (jnp.arange(D_pad, dtype=jnp.int32) < D).astype(jnp.float32)
    lane_mask = lane_mask.reshape(1, D_pad)

    # Deeper buffering on the streamed x tile only in the small-tile regime.
    x_tile_bytes = tm * D_pad * x_itemsize
    if n_row_tiles >= 4 and x_tile_bytes <= (1 << 20):
        x_spec = pl.BlockSpec((tm, D_pad), lambda j, i: (i, 0),
                              pipeline_mode=pl.Buffered(3))
    else:
        x_spec = pl.BlockSpec((tm, D_pad), lambda j, i: (i, 0))

    kernel = functools.partial(_prenorm_kernel, d_real=D, masked=masked,
                               compute_dtype=compute_dtype)

    out2 = pl.pallas_call(
        kernel,
        out_shape=jax.ShapeDtypeStruct((rows_pad, Dout_pad), x.dtype),
        grid_spec=pltpu.PrefetchScalarGridSpec(
            num_scalar_prefetch=0,
            # Dout tiles outer, rows inner: the weight tile stays resident in
            # VMEM across all row steps; x streams along the inner axis.
            grid=(n_out, n_row_tiles),
            in_specs=[
                x_spec,
                pl.BlockSpec((1, D_pad), lambda j, i: (0, 0)),                 # lane mask
                pl.BlockSpec((pl.Squeezed(), D_pad, tn), lambda j, i: (j, 0, 0)),  # weight
                pl.BlockSpec((1, tn), lambda j, i: (0, j)),                    # bias
            ],
            out_specs=pl.BlockSpec((tm, tn), lambda j, i: (i, j)),
        ),
        compiler_params=pltpu.CompilerParams(
            dimension_semantics=("parallel", "parallel"),
            vmem_limit_bytes=vmem_budget),
    )(x2, lane_mask, w_tiled, wb_p)

    if rows_pad != rows or Dout_pad != Dout:
        out2 = out2[:rows, :Dout]
    return out2.reshape(orig_shape[:-1] + (Dout,))


def _select_compute_dtype(x_dtype, w_dtype, use_bf16_matmul):
    if use_bf16_matmul is None:
        use_bf16 = (x_dtype == jnp.bfloat16 and w_dtype == jnp.bfloat16)
    else:
        use_bf16 = bool(use_bf16_matmul)
    return jnp.bfloat16 if use_bf16 else jnp.float32


@functools.partial(jax.jit, static_argnames=("tile_rows", "tile_n"))
def prenorm_linear_folded(x, w_fold, wb_fold, *, tile_rows=256, tile_n=None):
    """PreNorm forward with pre-folded (cached) weight/bias."""
    compute_dtype = jnp.bfloat16 if w_fold.dtype == jnp.bfloat16 else jnp.float32
    return _prenorm_linear_folded(x, w_fold, wb_fold, tile_rows=tile_rows,
                                  tile_n=tile_n, compute_dtype=compute_dtype)


@functools.partial(jax.jit,
                   static_argnames=("tile_rows", "tile_n", "use_bf16_matmul"))
def prenorm_linear(x, gamma, beta, w, wb, *, tile_rows=256, tile_n=None,
                   use_bf16_matmul=None):
    """PreNorm(dim, Linear(dim, dim)) forward.

    x:      (B, S, D)
    gamma:  (D,)      LayerNorm weight
    beta:   (D,)      LayerNorm bias
    w:      (D, Dout) Linear weight (x @ w convention)
    wb:     (Dout,)   Linear bias
    use_bf16_matmul: None = bf16 MXU only when x and w are bf16;
                     True  = force bf16 MXU operands (stats/bias stay f32);
                     False = full f32 matmul.
    returns (B, S, Dout) in x.dtype
    """
    compute_dtype = _select_compute_dtype(x.dtype, w.dtype, use_bf16_matmul)
    w_fold, wb_fold = fold_prenorm_params(gamma, beta, w, wb, compute_dtype)
    return _prenorm_linear_folded(x, w_fold, wb_fold, tile_rows=tile_rows,
                                  tile_n=tile_n, compute_dtype=compute_dtype)


def _reference(x, gamma, beta, w, wb):
    xf = x.astype(jnp.float32)
    mean = jnp.mean(xf, axis=-1, keepdims=True)
    var = jnp.mean((xf - mean) ** 2, axis=-1, keepdims=True)
    y = (xf - mean) / jnp.sqrt(var + EPS) * gamma.astype(jnp.float32) + beta.astype(jnp.float32)
    return (y @ w.astype(jnp.float32) + wb.astype(jnp.float32)).astype(x.dtype)


if __name__ == "__main__":
    # Small shapes implied by the module: batch=2, seq=8, hidden(dim)=32.
    B, S, D = 2, 8, 32
    key = jax.random.PRNGKey(0)
    kx, kw, kg, kb = jax.random.split(key, 4)

    x = jax.random.normal(kx, (B, S, D), dtype=jnp.float32)

    # Deterministic parameters (non-trivial gamma/beta to exercise the affine fold).
    gamma = 1.0 + 0.1 * jax.random.normal(kg, (D,), dtype=jnp.float32)
    beta = 0.1 * jax.random.normal(kb, (D,), dtype=jnp.float32)
    w = jax.random.normal(kw, (D, D), dtype=jnp.float32) * 0.02
    wb = jnp.zeros((D,), jnp.float32)

    out = prenorm_linear(x, gamma, beta, w, wb)
    jax.block_until_ready(out)

    ref = _reference(x, gamma, beta, w, wb)
    assert out.shape == (B, S, D)
    assert out.dtype == x.dtype
    assert jnp.allclose(out, ref, atol=2e-5, rtol=2e-5), "mismatch vs reference"

    print("KERNEL_OK")
</pallas_src>

<mosaic_0001>
module attributes {stable_mosaic.version = 11 : i64} {
  func.func @_prenorm_kernel(%arg0: i32, %arg1: i32, %arg2: memref<16x128xf32, #tpu.memory_space<vmem>>, %arg3: memref<1x128xf32, #tpu.memory_space<vmem>>, %arg4: memref<1x128x128xf32, #tpu.memory_space<vmem>>, %arg5: memref<1x128xf32, #tpu.memory_space<vmem>>, %arg6: memref<16x128xf32, #tpu.memory_space<vmem>>) attributes {dimension_semantics = [#tpu.dimension_semantics<parallel>, #tpu.dimension_semantics<parallel>], iteration_bounds = array<i64: 1, 1>, scalar_prefetch = 0 : i64, scratch_operands = 0 : i64, tpu.core_type = #tpu.core_type<tc>, window_params = [{transform_indices = @transform_0, window_bounds = array<i64: 16, 128>}, {pipeline_mode = #tpu.pipeline_mode<synchronous>, transform_indices = @transform_1, window_bounds = array<i64: 1, 128>}, {transform_indices = @transform_2, window_bounds = array<i64: 1, 128, 128>}, {transform_indices = @transform_3, window_bounds = array<i64: 1, 128>}, {transform_indices = @transform_4, window_bounds = array<i64: 16, 128>}]} {
    %c0 = arith.constant 0 : index
    %c0_0 = arith.constant 0 : index
    %0 = vector.load %arg2[%c0, %c0_0] : memref<16x128xf32, #tpu.memory_space<vmem>>, vector<16x128xf32>
    %cst = arith.constant dense<0.000000e+00> : vector<16xf32>
    %1 = vector.multi_reduction <add>, %0, %cst [1] : vector<16x128xf32> to vector<16xf32>
    %2 = vector.shape_cast %1 : vector<16xf32> to vector<16x1xf32>
    %cst_1 = arith.constant 3.125000e-02 : f32
    %3 = vector.broadcast %cst_1 : f32 to vector<16x1xf32>
    %4 = arith.mulf %2, %3 : vector<16x1xf32>
    %5 = vector.broadcast %4 : vector<16x1xf32> to vector<16x128xf32>
    %6 = arith.subf %0, %5 : vector<16x128xf32>
    %c0_2 = arith.constant 0 : index
    %c0_3 = arith.constant 0 : index
    %7 = vector.load %arg3[%c0_2, %c0_3] : memref<1x128xf32, #tpu.memory_space<vmem>>, vector<1x128xf32>
    %8 = vector.broadcast %7 : vector<1x128xf32> to vector<16x128xf32>
    %9 = arith.mulf %6, %8 : vector<16x128xf32>
    %10 = arith.mulf %9, %9 : vector<16x128xf32>
    %cst_4 = arith.constant dense<0.000000e+00> : vector<16xf32>
    %11 = vector.multi_reduction <add>, %10, %cst_4 [1] : vector<16x128xf32> to vector<16xf32>
    %12 = vector.shape_cast %11 : vector<16xf32> to vector<16x1xf32>
    %cst_5 = arith.constant 3.125000e-02 : f32
    %13 = vector.broadcast %cst_5 : f32 to vector<16x1xf32>
    %14 = arith.mulf %12, %13 : vector<16x1xf32>
    %cst_6 = arith.constant 9.99999974E-6 : f32
    %15 = vector.broadcast %cst_6 : f32 to vector<16x1xf32>
    %16 = arith.addf %14, %15 : vector<16x1xf32>
    %17 = math.rsqrt %16 : vector<16x1xf32>
    %18 = vector.broadcast %17 : vector<16x1xf32> to vector<16x128xf32>
    %19 = arith.mulf %9, %18 : vector<16x128xf32>
    %c0_7 = arith.constant 0 : index
    %c0_8 = arith.constant 0 : index
    %c0_9 = arith.constant 0 : index
    %20 = vector.load %arg4[%c0_7, %c0_8, %c0_9] : memref<1x128x128xf32, #tpu.memory_space<vmem>>, vector<1x128x128xf32>
    %21 = vector.shape_cast %20 : vector<1x128x128xf32> to vector<128x128xf32>
    %cst_10 = arith.constant dense<0.000000e+00> : vector<16x128xf32>
    %22 = tpu.matmul %19, %21, %cst_10 {dimension_numbers = #tpu.dot_dimension_numbers<[1], [0], [0], [1], [0, 0, 1, 1], [], []>} : vector<16x128xf32>, vector<128x128xf32>, vector<16x128xf32> -> vector<16x128xf32>
    %c0_11 = arith.constant 0 : index
    %c0_12 = arith.constant 0 : index
    %23 = vector.load %arg5[%c0_11, %c0_12] : memref<1x128xf32, #tpu.memory_space<vmem>>, vector<1x128xf32>
    %24 = vector.broadcast %23 : vector<1x128xf32> to vector<16x128xf32>
    %25 = arith.addf %22, %24 : vector<16x128xf32>
    %c0_13 = arith.constant 0 : index
    %c0_14 = arith.constant 0 : index
    %26 = vector.load %arg6[%c0_13, %c0_14] : memref<16x128xf32, #tpu.memory_space<vmem>>, vector<16x128xf32>
    tpu.vector_store %arg6[%c0_13, %c0_14], %25 {strides = array<i32>} : memref<16x128xf32, #tpu.memory_space<vmem>>, vector<16x128xf32>,
    return
  }
  func.func @transform_0(%arg0: i32, %arg1: i32) -> (i32, i32) {
    %c0_i32 = arith.constant 0 : i32
    %c0_i32_0 = arith.constant 0 : i32
    return %arg1, %c0_i32 : i32, i32
  }
  func.func @transform_1(%arg0: i32, %arg1: i32) -> (i32, i32) {
    %c0_i32 = arith.constant 0 : i32
    %c0_i32_0 = arith.constant 0 : i32
    %c0_i32_1 = arith.constant 0 : i32
    return %c0_i32, %c0_i32_0 : i32, i32
  }
  func.func @transform_2(%arg0: i32, %arg1: i32) -> (i32, i32, i32) {
    %c0_i32 = arith.constant 0 : i32
    %c0_i32_0 = arith.constant 0 : i32
    %c0_i32_1 = arith.constant 0 : i32
    return %arg0, %c0_i32, %c0_i32_0 : i32, i32, i32
  }
  func.func @transform_3(%arg0: i32, %arg1: i32) -> (i32, i32) {
    %c0_i32 = arith.constant 0 : i32
    %c0_i32_0 = arith.constant 0 : i32
    return %c0_i32, %arg0 : i32, i32
  }
  func.func @transform_4(%arg0: i32, %arg1: i32) -> (i32, i32) {
    %c0_i32 = arith.constant 0 : i32
    return %arg1, %arg0 : i32, i32
  }
}

</mosaic_0001>

<bundles_post_ra>
// kernel: prenorm_linear.1
= control target key start
LH: loop header
LB: loop body
LE: loop exit
PB: predicated region body
PF: predicated region fallthrough
CT: control target
= control target key end

     0   :  { %s336_s0 = inlined_call_operand.vmem [shape: f32[16,128], index: 0, kind: input, shape index: {}]   ;;  %s337_s2 = inlined_call_operand.vmem [shape: f32[1,128,128], index: 2, kind: input, shape index: {}]   ;;  %s338_s1 = inlined_call_operand.vmem [shape: f32[1,128], index: 1, kind: input, shape index: {}]   ;;  %s339_s3 = inlined_call_operand.vmem [shape: f32[1,128], index: 3, kind: input, shape index: {}]   ;;  %s340_s4 = inlined_call_operand.vmem [shape: f32[16,128], index: 4, kind: output, shape index: {}]  }
   0x1   :  { %v17_v0 = vld [vmem:[%s336_s0] sm:$0xff]  ;;  %v18_v1 = vld [vmem:[%s336_s0 + $0x8] sm:$0xff]  ;;  %v52_v4 = vld [vmem:[%s337_s2 + $0x10] sm:$0xff] }
   0x2   :  { %19 = vadd.xlane.f32.xlu0 %v17_v0  ;;  %v50_v2 = vld [vmem:[%s337_s2] sm:$0xff]  ;;  %v51_v3 = vld [vmem:[%s337_s2 + $0x8] sm:$0xff]  ;;  %v53_v6 = vld [vmem:[%s337_s2 + $0x18] sm:$0xff] }
   0x3   :  { %v209_v5 = vpack.c.bf16 %v51_v3, %v50_v2  ;;  %v213_v7 = vpack.c.bf16 %v53_v6, %v52_v4  ;;  %v54_v8 = vld [vmem:[%s337_s2 + $0x20] sm:$0xff]  ;;  %v55_v9 = vld [vmem:[%s337_s2 + $0x28] sm:$0xff]  ;;  %v56_v22 = vld [vmem:[%s337_s2 + $0x30] sm:$0xff] }
   0x4   :  { %v217_v10 = vpack.c.bf16 %v55_v9, %v54_v8  ;;  %v154_v13 = vld [vmem:[%s338_s1] ss:$0 sm:$0xff]  ;;  %v57_v23 = vld [vmem:[%s337_s2 + $0x38] sm:$0xff]  ;;  %v59_v26 = vld [vmem:[%s337_s2 + $0x48] sm:$0xff] }
   0x5   :  { %210 = vmatprep.subr.bf16.mxu0 %v209_v5  ;;  %v221_v24 = vpack.c.bf16 %v57_v23, %v56_v22  ;;  %v58_v25 = vld [vmem:[%s337_s2 + $0x40] sm:$0xff]  ;;  %v60_v28 = vld [vmem:[%s337_s2 + $0x50] sm:$0xff]  ;;  %v61_v29 = vld [vmem:[%s337_s2 + $0x58] sm:$0xff] }
   0x6   :  { %21 = vadd.xlane.f32.xlu0 %v18_v1  ;;  %212 = vmatpush3.bf16.msra.mxu0 %v209_v5  ;;  %v225_v27 = vpack.c.bf16 %v59_v26, %v58_v25  ;;  %v229_v30 = vpack.c.bf16 %v61_v29, %v60_v28  ;;  %v62_v31 = vld [vmem:[%s337_s2 + $0x60] sm:$0xff]  ;;  %v63_v32 = vld [vmem:[%s337_s2 + $0x68] sm:$0xff]  ;;  %v64_v33 = vld [vmem:[%s337_s2 + $0x70] sm:$0xff] }
   0x7   :  { %214 = vmatprep.subr.bf16.mxu0 %v213_v7  ;;  %v233_v34 = vpack.c.bf16 %v63_v32, %v62_v31  ;;  %v65_v35 = vld [vmem:[%s337_s2 + $0x78] sm:$0xff]  ;;  %v155_v47 = vld [vmem:[%s339_s3] ss:$0 sm:$0xff] }
   0x8   :  { %v237_v36 = vpack.c.bf16 %v65_v35, %v64_v33 }
   0xa   :  { %216 = vmatpush3.bf16.msra.mxu0 %v213_v7 }
   0xb   :  { %218 = vmatprep.subr.bf16.mxu0 %v217_v10 }
   0xe   :  { %220 = vmatpush3.bf16.msra.mxu0 %v217_v10 }
   0xf   :  { %222 = vmatprep.subr.bf16.mxu0 %v221_v24 }
  0x12   :  { %224 = vmatpush3.bf16.msra.mxu0 %v221_v24 }
  0x13   :  { %226 = vmatprep.subr.bf16.mxu0 %v225_v27 }
  0x16   :  { %228 = vmatpush3.bf16.msra.mxu0 %v225_v27 }
  0x17   :  { %230 = vmatprep.subr.bf16.mxu0 %v229_v30 }
  0x1a   :  { %232 = vmatpush3.bf16.msra.mxu0 %v229_v30 }
  0x1b   :  { %234 = vmatprep.subr.bf16.mxu0 %v233_v34 }
  0x1e   :  { %236 = vmatpush3.bf16.msra.mxu0 %v233_v34 }
  0x1f   :  { %238 = vmatprep.subr.bf16.mxu0 %v237_v36 }
  0x22   :  { %240 = vmatpush3.bf16.msra.mxu0 %v237_v36 }
  0x8f   :  { %v20_v11 = vpop.xlane.xlu0 %19 }
  0x90   :  { %v23_v12 = vmul.f32 0.03125, %v20_v11 }
  0x92   :  { %v25_v14 = vsub.f32 %v17_v0, %v23_v12 }
  0x93   :  { %v22_v15 = vpop.xlane.xlu0 %21 }
  0x94   :  { %v24_v16 = vmul.f32 0.03125, %v22_v15  ;;  %v34_v17 = vmul.f32 %v154_v13, %v25_v14 }
  0x96   :  { %v26_v18 = vsub.f32 %v18_v1, %v24_v16  ;;  %v36_v19 = vmul.f32 %v34_v17, %v34_v17 }
  0x98   :  { %38 = vadd.xlane.f32.xlu1 %v36_v19  ;;  %v35_v20 = vmul.f32 %v154_v13, %v26_v18 }
  0x9a   :  { %v37_v21 = vmul.f32 %v35_v20, %v35_v20 }
  0x9c   :  { %40 = vadd.xlane.f32.xlu1 %v37_v21 }
 0x125   :  { %v39_v37 = vpop.xlane.xlu1 %38 }
 0x126   :  { %v42_v38 = vmul.f32 0.03125, %v39_v37 }
 0x128   :  { %v44_v39 = vadd.f32 1e-05, %v42_v38 }
 0x129   :  { %v41_v40 = vpop.xlane.xlu1 %40 }
 0x12a   :  { %241 = vrsqrt.f32 %v44_v39  ;;  %v43_v41 = vmul.f32 0.03125, %v41_v40 }
 0x12c   :  { %v45_v42 = vadd.f32 1e-05, %v43_v41 }
 0x12e   :  { %243 = vrsqrt.f32 %v45_v42 }
 0x134   :  { %v242_v43 = vpop.eup %241 }
 0x135   :  { %v48_v44 = vmul.f32 %v242_v43, %v34_v17 }
 0x137   :  { %206 = vmatprep.mubr.f32.mxu0 %v48_v44 }
 0x138   :  { %v244_v45 = vpop.eup %243 }
 0x139   :  { %v49_v46 = vmul.f32 %v244_v45, %v35_v20 }
 0x13b   :  { %207 = vmatmul.mubr.f32.vlgmr.msra.gmra.mrb[0].mxu0 %v49_v46 }
 0x20e   :  { %v208_v48 = vpop.f32.mrb[0].mxu0 }
 0x20f   :  { %v145_v49 = vadd.f32 %v208_v48, %v155_v47  ;;  %v139_v50 = vpop.f32.mrb[1].mxu0 }
 0x210   :  { %v140_v51 = vadd.f32 %v155_v47, %v139_v50 }
 0x211   :  { %149 = vst [vmem:[%s340_s4 + $0x8] sm:$0xff] %v145_v49 }
 0x212   :  { %148 = vst [vmem:[%s340_s4] sm:$0xff] %v140_v51 }

</bundles_post_ra>
